<compile_context>
chip_gen: v7x
topology: tpu7x:2x2x1
jax: 0.10.0
libtpu: 0.0.40
codegen_flags: <defaults>
</compile_context>

<pallas_src>
import numpy as np
import jax
import jax.numpy as jnp
from jax.experimental import pallas as pl
from jax.experimental.pallas import tpu as pltpu  # noqa: F401  (not needed at these shapes)

# ----------------------------- model configuration -----------------------------
B = 2              # batch
N_VERT = 256       # number of mesh vertices (multiple of 128 -> lane friendly)
N_TRI = 128        # number of triangles
N_KP = 68          # landmarks
MAP_H = MAP_W = 16 # UV-map spatial size for diffuse / displacement maps
HW = MAP_H * MAP_W
THREE_N = 3 * N_VERT
N_IDEX = 144       # 80 id + 64 ex coefficients
N_BASIS = N_IDEX + 1   # + centered-meanshape row
FOCAL = 1015.0
IMG_SIZE = 256
COEFF_DIM = 257    # 80 id + 64 ex + 80 tex + 3 angles + 27 gamma + 3 translation


# =============================== Pallas kernels ================================

def _geometry_kernel(coeff_ref, base_ref, disp_ref, diff_ref, wt_ref,
                     shape_ref, dispsamp_ref, texsamp_ref):
    # coeff_ref: (B, 145) f32   -- [id_coeff | ex_coeff | 1.0]
    # base_ref : (145, 3N) bf16 -- [idBase^T ; exBase^T ; centered meanshape]
    # disp_ref : (B*3, HW) f32  -- displacement map channels, flattened
    # diff_ref : (B*3, HW) f32  -- diffuse map channels, flattened
    # wt_ref   : (HW, N) bf16   -- bilinear sampling weight matrix
    #
    # Shape formation (meanshape + centering folded into the last basis row).
    shape_ref[...] = jnp.dot(coeff_ref[...].astype(jnp.bfloat16), base_ref[...],
                             preferred_element_type=jnp.float32)
    # grid_sample of displacement map (with the *0.01 scale folded in) and diffuse map.
    dispsamp_ref[...] = 0.01 * jnp.dot(disp_ref[...].astype(jnp.bfloat16), wt_ref[...],
                                       preferred_element_type=jnp.float32)
    texsamp_ref[...] = jnp.dot(diff_ref[...].astype(jnp.bfloat16), wt_ref[...],
                               preferred_element_type=jnp.float32)


def geometry_pallas(coeff_aug, base_aug, disp_flat, diff_flat, w_sample_T):
    return pl.pallas_call(
        _geometry_kernel,
        out_shape=(
            jax.ShapeDtypeStruct((B, THREE_N), jnp.float32),      # centered face shape
            jax.ShapeDtypeStruct((B * 3, N_VERT), jnp.float32),   # 0.01 * sampled displacement
            jax.ShapeDtypeStruct((B * 3, N_VERT), jnp.float32),   # sampled diffuse texture
        ),
        in_specs=[
            pl.BlockSpec((B, N_BASIS)),
            pl.BlockSpec((N_BASIS, THREE_N)),
            pl.BlockSpec((B * 3, HW)),
            pl.BlockSpec((B * 3, HW)),
            pl.BlockSpec((HW, N_VERT)),
        ],
        out_specs=(
            pl.BlockSpec((B, THREE_N)),
            pl.BlockSpec((B * 3, N_VERT)),
            pl.BlockSpec((B * 3, N_VERT)),
        ),
    )(coeff_aug, base_aug, disp_flat, diff_flat, w_sample_T)


def _illumination_kernel(tex_ref, norm_ref, gamma_ref, out_ref):
    # tex/norm: (B*3, N) f32 channels-first rows, gamma: (B*3, 9) f32.
    # Band-0 "+0.8" offset is folded here as a constant add (0.8 * a0 * c0).
    a0 = np.pi
    a1 = 2.0 * np.pi / np.sqrt(3.0)
    a2 = 2.0 * np.pi / np.sqrt(8.0)
    c0 = 1.0 / np.sqrt(4.0 * np.pi)
    c1 = np.sqrt(3.0) / np.sqrt(4.0 * np.pi)
    c2 = 3.0 * np.sqrt(5.0) / np.sqrt(12.0 * np.pi)
    d0 = 0.5 / np.sqrt(3.0)

    tex = tex_ref[...]      # (B*3, N)
    norm = norm_ref[...]    # (B*3, N)
    gamma = gamma_ref[...]  # (B*3, 9)

    out_rows = []
    for b in range(B):  # static unroll (B is tiny)
        nx = norm[3 * b + 0:3 * b + 1, :]   # (1, N)
        ny = norm[3 * b + 1:3 * b + 2, :]
        nz = norm[3 * b + 2:3 * b + 3, :]
        ones = jnp.ones_like(nx)
        # 9 SH basis rows stacked -> (9, N), all f32 (no bf16 VPU path on v5e).
        H = jnp.concatenate([
            (a0 * c0) * ones,
            (-a1 * c1) * ny,
            (a1 * c1) * nz,
            (-a1 * c1) * nx,
            (a2 * c2) * nx * ny,
            (-a2 * c2) * ny * nz,
            (a2 * c2 * d0) * (3.0 * nz * nz - 1.0),
            (-a2 * c2) * nx * nz,
            (a2 * c2 * 0.5) * (nx * nx - ny * ny),
        ], axis=0)
        # lighting[c, n] = sum_k gamma[b, c, k] * H[k, n]  (one small MXU matmul,
        # replaces 9 lane-extract broadcasts + serial VPU FMA chain).
        lighting = jnp.dot(gamma[3 * b:3 * b + 3, :], H,
                           preferred_element_type=jnp.float32) + (0.8 * a0 * c0)
        out_rows.append(tex[3 * b:3 * b + 3, :] * lighting)

    out_ref[...] = jnp.concatenate(out_rows, axis=0)   # single lane-dense store


def illumination_pallas(tex_flat, norm_flat, gamma_flat):
    # tex/norm: (B*3, N_VERT), gamma: (B*3, 9) -> (B*3, N_VERT)
    return pl.pallas_call(
        _illumination_kernel,
        out_shape=jax.ShapeDtypeStruct((B * 3, N_VERT), jnp.float32),
        in_specs=[
            pl.BlockSpec((B * 3, N_VERT)),
            pl.BlockSpec((B * 3, N_VERT)),
            pl.BlockSpec((B * 3, 9)),
        ],
        out_specs=pl.BlockSpec((B * 3, N_VERT)),
    )(tex_flat, norm_flat, gamma_flat)


# ================================ JAX glue ops =================================

def process_uv(uv_coords, uv_h=256, uv_w=256):
    x = uv_coords[:, 0] * (uv_w - 1)
    y = uv_coords[:, 1] * (uv_h - 1)
    y = uv_h - y - 1.0
    return jnp.stack([x, y, jnp.zeros_like(x)], axis=1)


def bilinear_weight_matrix(grid_xy, h, w):
    """grid_xy: (N, 2) in [-1,1] (x, y) -> (N, h*w) bilinear weight matrix.
    Matches F.grid_sample(mode='bilinear', padding_mode='zeros', align_corners=False)."""
    ix = ((grid_xy[:, 0] + 1.0) * w - 1.0) / 2.0
    iy = ((grid_xy[:, 1] + 1.0) * h - 1.0) / 2.0
    ix0 = jnp.floor(ix)
    iy0 = jnp.floor(iy)
    ix1 = ix0 + 1.0
    iy1 = iy0 + 1.0
    wx1 = ix - ix0
    wx0 = 1.0 - wx1
    wy1 = iy - iy0
    wy0 = 1.0 - wy1

    corners = [
        (ix0, iy0, wx0 * wy0),
        (ix1, iy0, wx1 * wy0),
        (ix0, iy1, wx0 * wy1),
        (ix1, iy1, wx1 * wy1),
    ]
    wmat = jnp.zeros((grid_xy.shape[0], h * w), jnp.float32)
    for cx, cy, wgt in corners:
        valid = (cx >= 0) & (cx < w) & (cy >= 0) & (cy < h)
        flat = jnp.clip(cy.astype(jnp.int32) * w + cx.astype(jnp.int32), 0, h * w - 1)
        wmat = wmat + jax.nn.one_hot(flat, h * w, dtype=jnp.float32) * (
            wgt * valid.astype(jnp.float32))[:, None]
    return wmat


def compute_rotation_matrix(angles):
    sinx, siny, sinz = jnp.sin(angles[:, 0]), jnp.sin(angles[:, 1]), jnp.sin(angles[:, 2])
    cosx, cosy, cosz = jnp.cos(angles[:, 0]), jnp.cos(angles[:, 1]), jnp.cos(angles[:, 2])
    zero = jnp.zeros_like(sinx)
    one = jnp.ones_like(sinx)

    rotX = jnp.stack([
        jnp.stack([one, zero, zero], -1),
        jnp.stack([zero, cosx, -sinx], -1),
        jnp.stack([zero, sinx, cosx], -1)], -2)
    rotY = jnp.stack([
        jnp.stack([cosy, zero, siny], -1),
        jnp.stack([zero, one, zero], -1),
        jnp.stack([-siny, zero, cosy], -1)], -2)
    rotZ = jnp.stack([
        jnp.stack([cosz, -sinz, zero], -1),
        jnp.stack([sinz, cosz, zero], -1),
        jnp.stack([zero, zero, one], -1)], -2)

    rotation = jnp.einsum('bij,bjk->bik', jnp.einsum('bij,bjk->bik', rotZ, rotY), rotX)
    return jnp.transpose(rotation, (0, 2, 1))


def compute_norm(face_shape, tri, point_buf):
    face_id = tri.astype(jnp.int32) - 1         # (N_TRI, 3)
    point_id = point_buf.astype(jnp.int32) - 1  # (N_VERT, 8)
    v1 = face_shape[:, face_id[:, 0], :]
    v2 = face_shape[:, face_id[:, 1], :]
    v3 = face_shape[:, face_id[:, 2], :]
    e1 = v1 - v2
    e2 = v2 - v3
    face_norm = jnp.cross(e1, e2)               # (B, N_TRI, 3)
    empty = jnp.zeros((face_norm.shape[0], 1, 3), face_norm.dtype)
    face_norm = jnp.concatenate([face_norm, empty], axis=1)
    v_norm = face_norm[:, point_id, :].sum(axis=2)            # (B, N_VERT, 3)
    denom = jnp.maximum(jnp.linalg.norm(v_norm, axis=2, keepdims=True), 1e-8)
    return v_norm / denom


def projection_block(face_shape):
    half = IMG_SIZE // 2
    camera_pos = jnp.array([0.0, 0.0, 10.0], jnp.float32).reshape(1, 1, 3)
    p_matrix = jnp.array([[FOCAL, 0.0, half],
                          [0.0, FOCAL, half],
                          [0.0, 0.0, 1.0]], jnp.float32)
    reverse_z = jnp.diag(jnp.array([1.0, 1.0, -1.0], jnp.float32))
    fs = jnp.einsum('bnd,dk->bnk', face_shape, reverse_z) + camera_pos
    aug = jnp.einsum('bnd,kd->bnk', fs, p_matrix)
    return aug[:, :, :2] / aug[:, :, 2:3]


# ============================== parameter setup ================================

def init_params(key):
    ks = jax.random.split(key, 8)
    idBase = jax.random.normal(ks[0], (THREE_N, 80), jnp.float32) * 0.01
    exBase = jax.random.normal(ks[1], (THREE_N, 64), jnp.float32) * 0.01
    meanshape = jax.random.normal(ks[2], (1, THREE_N), jnp.float32) * 0.1
    tri = jax.random.randint(ks[3], (N_TRI, 3), 1, N_VERT + 1).astype(jnp.float32)
    point_buf = jax.random.randint(ks[4], (N_VERT, 8), 1, N_TRI + 2).astype(jnp.float32)
    keypoints = jax.random.randint(ks[5], (N_KP,), 1, N_VERT + 1)
    uv_refine = jax.random.uniform(ks[6], (N_VERT, 2), jnp.float32)  # [0,1]^2

    # mimic __init__ uv processing
    uv = process_uv(uv_refine, 256, 256)
    uv_coord_2 = uv[:, :2] / 255.0 * 2.0 - 1.0       # (N_VERT, 2) in [-1, 1]

    # Fold meanshape add AND the "- meanshape.mean()" centering into one extra
    # basis row, so the geometry kernel emits an already-centered shape.
    center = meanshape.reshape(-1, 3).mean(axis=0)                         # (3,)
    meanshape_centered = meanshape - jnp.tile(center, N_VERT)[None, :]     # (1, 3N)

    # Augmented basis [idBase^T ; exBase^T ; centered meanshape] stored bf16.
    base_aug = jnp.concatenate(
        [idBase.T, exBase.T, meanshape_centered], axis=0).astype(jnp.bfloat16)  # (145, 3N)
    # Bilinear sampling weight matrix stored bf16.
    w_sample_T = bilinear_weight_matrix(uv_coord_2, MAP_H, MAP_W).T.astype(jnp.bfloat16)

    return dict(
        base_aug=base_aug,                            # (145, 3N) bf16
        tri=tri, point_buf=point_buf,
        kp_inds=(keypoints - 1).astype(jnp.int32),
        w_sample_T=w_sample_T,                        # (HW, N_VERT) bf16
    )


# ================================= forward =====================================

def forward(params, coeff_3dmm, diffuse_map, displacement_map, need_illu=True):
    id_ex_coeff = coeff_3dmm[:, :N_IDEX]           # [id | ex]
    angles = coeff_3dmm[:, 224:227]
    gamma = coeff_3dmm[:, 227:254]
    translation = coeff_3dmm[:, 254:257]

    # Constant-1 column selects the centered-meanshape row of the augmented basis.
    coeff_aug = jnp.concatenate(
        [id_ex_coeff, jnp.ones((id_ex_coeff.shape[0], 1), id_ex_coeff.dtype)], axis=1)
    disp_flat = displacement_map.reshape(B * 3, HW)
    diff_flat = diffuse_map.reshape(B * 3, HW)

    # --- fused geometry kernel: shape formation + both grid_samples (Pallas) ---
    face_shape_flat, uv_vertex_t, face_texture_t = geometry_pallas(
        coeff_aug, params['base_aug'], disp_flat, diff_flat, params['w_sample_T'])

    # Kernel already applied centering and the *0.01 displacement scale.
    face_shape_ori = face_shape_flat.reshape(B, N_VERT, 3)
    uv_vertex = jnp.transpose(uv_vertex_t.reshape(B, 3, N_VERT), (0, 2, 1))   # (B, N, 3)
    face_shape = face_shape_ori + uv_vertex

    # --- normals, rotation, rigid transform, landmarks (JAX glue) ---
    face_norm = compute_norm(face_shape, params['tri'], params['point_buf'])
    rotation = compute_rotation_matrix(angles)
    face_norm_r = jnp.einsum('bnd,bdk->bnk', face_norm, rotation)
    face_shape_t = jnp.einsum('bnd,bdk->bnk', face_shape, rotation) + translation[:, None, :]
    face_lms_t = face_shape_t[:, params['kp_inds'], :]
    lms = projection_block(face_lms_t)
    lms = jnp.stack([lms[:, :, 0], IMG_SIZE - lms[:, :, 1]], axis=2)
    tri0 = params['tri'] - 1.0

    # --- illumination layer (Pallas, flattened channels-first rows) ---
    if need_illu:
        gamma_flat = gamma.reshape(B * 3, 9)                      # +0.8 folded in-kernel
        norm_flat = jnp.transpose(face_norm_r, (0, 2, 1)).reshape(B * 3, N_VERT)
        face_color_flat = illumination_pallas(face_texture_t, norm_flat, gamma_flat)
        face_color = jnp.transpose(face_color_flat.reshape(B, 3, N_VERT), (0, 2, 1))
    else:
        face_color = jnp.transpose(face_texture_t.reshape(B, 3, N_VERT), (0, 2, 1))

    # TODO(synk): MeshRenderer rasterization (pytorch3d) not translatable to Pallas;
    # return mesh components + per-vertex shaded colors as the "rendered" proxy.
    mesh = (face_shape_t, jnp.tile(tri0[None], (B, 1, 1)), face_color)
    rendered_img = face_color
    return rendered_img, lms, face_shape, mesh, coeff_3dmm, tri0


# =================================== main ======================================

if __name__ == "__main__":
    key = jax.random.PRNGKey(0)
    k_param, k_coeff, k_diff, k_disp = jax.random.split(key, 4)

    params = init_params(k_param)

    coeff_3dmm = jax.random.normal(k_coeff, (B, COEFF_DIM), jnp.float32) * 0.1
    diffuse_map = jax.random.uniform(k_diff, (B, 3, MAP_H, MAP_W), jnp.float32)
    displacement_map = jax.random.normal(k_disp, (B, 3, MAP_H, MAP_W), jnp.float32)

    fwd = jax.jit(lambda c, dm, pm: forward(params, c, dm, pm, need_illu=True))
    rendered_img, lms, face_shape, mesh, coeff_out, tri0 = fwd(
        coeff_3dmm, diffuse_map, displacement_map)

    jax.block_until_ready(rendered_img)
    jax.block_until_ready(lms)
    jax.block_until_ready(face_shape)
    jax.block_until_ready(mesh)

    assert rendered_img.shape == (B, N_VERT, 3)
    assert lms.shape == (B, N_KP, 2)
    assert face_shape.shape == (B, N_VERT, 3)
    assert not bool(jnp.any(jnp.isnan(rendered_img)))
    assert not bool(jnp.any(jnp.isnan(lms)))
    assert not bool(jnp.any(jnp.isnan(face_shape)))

    print("KERNEL_OK")
</pallas_src>

<mosaic_0001>
module attributes {stable_mosaic.version = 11 : i64} {
  func.func @_geometry_kernel(%arg0: memref<2x145xf32, #tpu.memory_space<vmem>>, %arg1: memref<145x768xbf16, #tpu.memory_space<vmem>>, %arg2: memref<6x256xf32, #tpu.memory_space<vmem>>, %arg3: memref<6x256xf32, #tpu.memory_space<vmem>>, %arg4: memref<256x256xbf16, #tpu.memory_space<vmem>>, %arg5: memref<2x768xf32, #tpu.memory_space<vmem>>, %arg6: memref<6x256xf32, #tpu.memory_space<vmem>>, %arg7: memref<6x256xf32, #tpu.memory_space<vmem>>) attributes {dimension_semantics = [], scalar_prefetch = 0 : i64, scratch_operands = 0 : i64, tpu.core_type = #tpu.core_type<tc>} {
    %c0 = arith.constant 0 : index
    %c0_0 = arith.constant 0 : index
    %0 = vector.load %arg0[%c0, %c0_0] : memref<2x145xf32, #tpu.memory_space<vmem>>, vector<2x145xf32>
    %1 = arith.truncf %0 : vector<2x145xf32> to vector<2x145xbf16>
    %c0_1 = arith.constant 0 : index
    %c0_2 = arith.constant 0 : index
    %2 = vector.load %arg1[%c0_1, %c0_2] : memref<145x768xbf16, #tpu.memory_space<vmem>>, vector<145x768xbf16>
    %cst = arith.constant dense<0.000000e+00> : vector<2x768xf32>
    %3 = tpu.matmul %1, %2, %cst {dimension_numbers = #tpu.dot_dimension_numbers<[1], [0], [0], [1], [0, 0, 1, 1], [], []>} : vector<2x145xbf16>, vector<145x768xbf16>, vector<2x768xf32> -> vector<2x768xf32>
    %c0_3 = arith.constant 0 : index
    %c0_4 = arith.constant 0 : index
    %4 = vector.load %arg5[%c0_3, %c0_4] : memref<2x768xf32, #tpu.memory_space<vmem>>, vector<2x768xf32>
    tpu.vector_store %arg5[%c0_3, %c0_4], %3 {strides = array<i32>} : memref<2x768xf32, #tpu.memory_space<vmem>>, vector<2x768xf32>,
    %c0_5 = arith.constant 0 : index
    %c0_6 = arith.constant 0 : index
    %5 = vector.load %arg2[%c0_5, %c0_6] : memref<6x256xf32, #tpu.memory_space<vmem>>, vector<6x256xf32>
    %6 = arith.truncf %5 : vector<6x256xf32> to vector<6x256xbf16>
    %c0_7 = arith.constant 0 : index
    %c0_8 = arith.constant 0 : index
    %7 = vector.load %arg4[%c0_7, %c0_8] : memref<256x256xbf16, #tpu.memory_space<vmem>>, vector<256x256xbf16>
    %cst_9 = arith.constant dense<0.000000e+00> : vector<6x256xf32>
    %8 = tpu.matmul %6, %7, %cst_9 {dimension_numbers = #tpu.dot_dimension_numbers<[1], [0], [0], [1], [0, 0, 1, 1], [], []>} : vector<6x256xbf16>, vector<256x256xbf16>, vector<6x256xf32> -> vector<6x256xf32>
    %cst_10 = arith.constant 0.00999999977 : f32
    %9 = vector.broadcast %cst_10 : f32 to vector<6x256xf32>
    %10 = arith.mulf %9, %8 : vector<6x256xf32>
    %c0_11 = arith.constant 0 : index
    %c0_12 = arith.constant 0 : index
    %11 = vector.load %arg6[%c0_11, %c0_12] : memref<6x256xf32, #tpu.memory_space<vmem>>, vector<6x256xf32>
    tpu.vector_store %arg6[%c0_11, %c0_12], %10 {strides = array<i32>} : memref<6x256xf32, #tpu.memory_space<vmem>>, vector<6x256xf32>,
    %c0_13 = arith.constant 0 : index
    %c0_14 = arith.constant 0 : index
    %12 = vector.load %arg3[%c0_13, %c0_14] : memref<6x256xf32, #tpu.memory_space<vmem>>, vector<6x256xf32>
    %13 = arith.truncf %12 : vector<6x256xf32> to vector<6x256xbf16>
    %c0_15 = arith.constant 0 : index
    %c0_16 = arith.constant 0 : index
    %14 = vector.load %arg4[%c0_15, %c0_16] : memref<256x256xbf16, #tpu.memory_space<vmem>>, vector<256x256xbf16>
    %cst_17 = arith.constant dense<0.000000e+00> : vector<6x256xf32>
    %15 = tpu.matmul %13, %14, %cst_17 {dimension_numbers = #tpu.dot_dimension_numbers<[1], [0], [0], [1], [0, 0, 1, 1], [], []>} : vector<6x256xbf16>, vector<256x256xbf16>, vector<6x256xf32> -> vector<6x256xf32>
    %c0_18 = arith.constant 0 : index
    %c0_19 = arith.constant 0 : index
    %16 = vector.load %arg7[%c0_18, %c0_19] : memref<6x256xf32, #tpu.memory_space<vmem>>, vector<6x256xf32>
    tpu.vector_store %arg7[%c0_18, %c0_19], %15 {strides = array<i32>} : memref<6x256xf32, #tpu.memory_space<vmem>>, vector<6x256xf32>,
    return
  }
}

module attributes {stable_mosaic.version = 11 : i64} {
  func.func @_illumination_kernel(%arg0: memref<6x256xf32, #tpu.memory_space<vmem>>, %arg1: memref<6x256xf32, #tpu.memory_space<vmem>>, %arg2: memref<6x9xf32, #tpu.memory_space<vmem>>, %arg3: memref<6x256xf32, #tpu.memory_space<vmem>>) attributes {dimension_semantics = [], scalar_prefetch = 0 : i64, scratch_operands = 0 : i64, tpu.core_type = #tpu.core_type<tc>} {
    %c0 = arith.constant 0 : index
    %c0_0 = arith.constant 0 : index
    %0 = vector.load %arg0[%c0, %c0_0] : memref<6x256xf32, #tpu.memory_space<vmem>>, vector<6x256xf32>
    %c0_1 = arith.constant 0 : index
    %c0_2 = arith.constant 0 : index
    %1 = vector.load %arg1[%c0_1, %c0_2] : memref<6x256xf32, #tpu.memory_space<vmem>>, vector<6x256xf32>
    %c0_3 = arith.constant 0 : index
    %c0_4 = arith.constant 0 : index
    %2 = vector.load %arg2[%c0_3, %c0_4] : memref<6x9xf32, #tpu.memory_space<vmem>>, vector<6x9xf32>
    %3 = vector.extract_strided_slice %1 {offsets = [0, 0], sizes = [1, 256], strides = [1, 1]} : vector<6x256xf32> to vector<1x256xf32>
    %4 = vector.extract_strided_slice %1 {offsets = [1, 0], sizes = [1, 256], strides = [1, 1]} : vector<6x256xf32> to vector<1x256xf32>
    %5 = vector.extract_strided_slice %1 {offsets = [2, 0], sizes = [1, 256], strides = [1, 1]} : vector<6x256xf32> to vector<1x256xf32>
    %cst = arith.constant 1.000000e+00 : f32
    %6 = vector.broadcast %cst : f32 to vector<1x256xf32>
    %cst_5 = arith.constant 0.886226952 : f32
    %7 = vector.broadcast %cst_5 : f32 to vector<1x256xf32>
    %8 = arith.mulf %7, %6 : vector<1x256xf32>
    %cst_6 = arith.constant -1.7724539 : f32
    %9 = vector.broadcast %cst_6 : f32 to vector<1x256xf32>
    %10 = arith.mulf %9, %4 : vector<1x256xf32>
    %cst_7 = arith.constant 1.7724539 : f32
    %11 = vector.broadcast %cst_7 : f32 to vector<1x256xf32>
    %12 = arith.mulf %11, %5 : vector<1x256xf32>
    %cst_8 = arith.constant -1.7724539 : f32
    %13 = vector.broadcast %cst_8 : f32 to vector<1x256xf32>
    %14 = arith.mulf %13, %3 : vector<1x256xf32>
    %cst_9 = arith.constant 2.42703247 : f32
    %15 = vector.broadcast %cst_9 : f32 to vector<1x256xf32>
    %16 = arith.mulf %15, %3 : vector<1x256xf32>
    %17 = arith.mulf %16, %4 : vector<1x256xf32>
    %cst_10 = arith.constant -2.42703247 : f32
    %18 = vector.broadcast %cst_10 : f32 to vector<1x256xf32>
    %19 = arith.mulf %18, %4 : vector<1x256xf32>
    %20 = arith.mulf %19, %5 : vector<1x256xf32>
    %cst_11 = arith.constant 3.000000e+00 : f32
    %21 = vector.broadcast %cst_11 : f32 to vector<1x256xf32>
    %22 = arith.mulf %21, %5 : vector<1x256xf32>
    %23 = arith.mulf %22, %5 : vector<1x256xf32>
    %cst_12 = arith.constant 1.000000e+00 : f32
    %24 = vector.broadcast %cst_12 : f32 to vector<1x256xf32>
    %25 = arith.subf %23, %24 : vector<1x256xf32>
    %cst_13 = arith.constant 0.700623929 : f32
    %26 = vector.broadcast %cst_13 : f32 to vector<1x256xf32>
    %27 = arith.mulf %26, %25 : vector<1x256xf32>
    %cst_14 = arith.constant -2.42703247 : f32
    %28 = vector.broadcast %cst_14 : f32 to vector<1x256xf32>
    %29 = arith.mulf %28, %3 : vector<1x256xf32>
    %30 = arith.mulf %29, %5 : vector<1x256xf32>
    %31 = arith.mulf %3, %3 : vector<1x256xf32>
    %32 = arith.mulf %4, %4 : vector<1x256xf32>
    %33 = arith.subf %31, %32 : vector<1x256xf32>
    %cst_15 = arith.constant 1.21351624 : f32
    %34 = vector.broadcast %cst_15 : f32 to vector<1x256xf32>
    %35 = arith.mulf %34, %33 : vector<1x256xf32>
    %36 = tpu.concatenate %8, %10, %12, %14, %17, %20, %27, %30, %35 in 0 : vector<1x256xf32>, vector<1x256xf32>, vector<1x256xf32>, vector<1x256xf32>, vector<1x256xf32>, vector<1x256xf32>, vector<1x256xf32>, vector<1x256xf32>, vector<1x256xf32> -> vector<9x256xf32>
    %37 = vector.extract_strided_slice %2 {offsets = [0, 0], sizes = [3, 9], strides = [1, 1]} : vector<6x9xf32> to vector<3x9xf32>
    %cst_16 = arith.constant dense<0.000000e+00> : vector<3x256xf32>
    %38 = tpu.matmul %37, %36, %cst_16 {dimension_numbers = #tpu.dot_dimension_numbers<[1], [0], [0], [1], [0, 0, 1, 1], [], []>} : vector<3x9xf32>, vector<9x256xf32>, vector<3x256xf32> -> vector<3x256xf32>
    %cst_17 = arith.constant 0.708981514 : f32
    %39 = vector.broadcast %cst_17 : f32 to vector<3x256xf32>
    %40 = arith.addf %38, %39 : vector<3x256xf32>
    %41 = vector.extract_strided_slice %0 {offsets = [0, 0], sizes = [3, 256], strides = [1, 1]} : vector<6x256xf32> to vector<3x256xf32>
    %42 = arith.mulf %41, %40 : vector<3x256xf32>
    %43 = vector.extract_strided_slice %1 {offsets = [3, 0], sizes = [1, 256], strides = [1, 1]} : vector<6x256xf32> to vector<1x256xf32>
    %44 = vector.extract_strided_slice %1 {offsets = [4, 0], sizes = [1, 256], strides = [1, 1]} : vector<6x256xf32> to vector<1x256xf32>
    %45 = vector.extract_strided_slice %1 {offsets = [5, 0], sizes = [1, 256], strides = [1, 1]} : vector<6x256xf32> to vector<1x256xf32>
    %cst_18 = arith.constant 1.000000e+00 : f32
    %46 = vector.broadcast %cst_18 : f32 to vector<1x256xf32>
    %cst_19 = arith.constant 0.886226952 : f32
    %47 = vector.broadcast %cst_19 : f32 to vector<1x256xf32>
    %48 = arith.mulf %47, %46 : vector<1x256xf32>
    %cst_20 = arith.constant -1.7724539 : f32
    %49 = vector.broadcast %cst_20 : f32 to vector<1x256xf32>
    %50 = arith.mulf %49, %44 : vector<1x256xf32>
    %cst_21 = arith.constant 1.7724539 : f32
    %51 = vector.broadcast %cst_21 : f32 to vector<1x256xf32>
    %52 = arith.mulf %51, %45 : vector<1x256xf32>
    %cst_22 = arith.constant -1.7724539 : f32
    %53 = vector.broadcast %cst_22 : f32 to vector<1x256xf32>
    %54 = arith.mulf %53, %43 : vector<1x256xf32>
    %cst_23 = arith.constant 2.42703247 : f32
    %55 = vector.broadcast %cst_23 : f32 to vector<1x256xf32>
    %56 = arith.mulf %55, %43 : vector<1x256xf32>
    %57 = arith.mulf %56, %44 : vector<1x256xf32>
    %cst_24 = arith.constant -2.42703247 : f32
    %58 = vector.broadcast %cst_24 : f32 to vector<1x256xf32>
    %59 = arith.mulf %58, %44 : vector<1x256xf32>
    %60 = arith.mulf %59, %45 : vector<1x256xf32>
    %cst_25 = arith.constant 3.000000e+00 : f32
    %61 = vector.broadcast %cst_25 : f32 to vector<1x256xf32>
    %62 = arith.mulf %61, %45 : vector<1x256xf32>
    %63 = arith.mulf %62, %45 : vector<1x256xf32>
    %cst_26 = arith.constant 1.000000e+00 : f32
    %64 = vector.broadcast %cst_26 : f32 to vector<1x256xf32>
    %65 = arith.subf %63, %64 : vector<1x256xf32>
    %cst_27 = arith.constant 0.700623929 : f32
    %66 = vector.broadcast %cst_27 : f32 to vector<1x256xf32>
    %67 = arith.mulf %66, %65 : vector<1x256xf32>
    %cst_28 = arith.constant -2.42703247 : f32
    %68 = vector.broadcast %cst_28 : f32 to vector<1x256xf32>
    %69 = arith.mulf %68, %43 : vector<1x256xf32>
    %70 = arith.mulf %69, %45 : vector<1x256xf32>
    %71 = arith.mulf %43, %43 : vector<1x256xf32>
    %72 = arith.mulf %44, %44 : vector<1x256xf32>
    %73 = arith.subf %71, %72 : vector<1x256xf32>
    %cst_29 = arith.constant 1.21351624 : f32
    %74 = vector.broadcast %cst_29 : f32 to vector<1x256xf32>
    %75 = arith.mulf %74, %73 : vector<1x256xf32>
    %76 = tpu.concatenate %48, %50, %52, %54, %57, %60, %67, %70, %75 in 0 : vector<1x256xf32>, vector<1x256xf32>, vector<1x256xf32>, vector<1x256xf32>, vector<1x256xf32>, vector<1x256xf32>, vector<1x256xf32>, vector<1x256xf32>, vector<1x256xf32> -> vector<9x256xf32>
    %77 = vector.extract_strided_slice %2 {offsets = [3, 0], sizes = [3, 9], strides = [1, 1]} : vector<6x9xf32> to vector<3x9xf32>
    %cst_30 = arith.constant dense<0.000000e+00> : vector<3x256xf32>
    %78 = tpu.matmul %77, %76, %cst_30 {dimension_numbers = #tpu.dot_dimension_numbers<[1], [0], [0], [1], [0, 0, 1, 1], [], []>} : vector<3x9xf32>, vector<9x256xf32>, vector<3x256xf32> -> vector<3x256xf32>
    %cst_31 = arith.constant 0.708981514 : f32
    %79 = vector.broadcast %cst_31 : f32 to vector<3x256xf32>
    %80 = arith.addf %78, %79 : vector<3x256xf32>
    %81 = vector.extract_strided_slice %0 {offsets = [3, 0], sizes = [3, 256], strides = [1, 1]} : vector<6x256xf32> to vector<3x256xf32>
    %82 = arith.mulf %81, %80 : vector<3x256xf32>
    %83 = tpu.concatenate %42, %82 in 0 : vector<3x256xf32>, vector<3x256xf32> -> vector<6x256xf32>
    %c0_32 = arith.constant 0 : index
    %c0_33 = arith.constant 0 : index
    %84 = vector.load %arg3[%c0_32, %c0_33] : memref<6x256xf32, #tpu.memory_space<vmem>>, vector<6x256xf32>
    tpu.vector_store %arg3[%c0_32, %c0_33], %83 {strides = array<i32>} : memref<6x256xf32, #tpu.memory_space<vmem>>, vector<6x256xf32>,
    return
  }
}

</mosaic_0001>

<bundles_post_ra>
// kernel: _lambda_.2
= control target key start
LH: loop header
LB: loop body
LE: loop exit
PB: predicated region body
PF: predicated region fallthrough
CT: control target
= control target key end

     0   :  { %13 = vsyncpa [#allocation3], 0  ;;  %s1363_s24 = smov [#allocation2]   ;;  %s1633_s0 = inlined_call_operand.vmem [shape: f32[2,145], index: 0, kind: input, shape index: {}]   ;;  %s1634_s1 = inlined_call_operand.hbm [shape: bf16[145,768], index: 1, kind: input, shape index: {}]   ;;  %s1635_s2 = inlined_call_operand.vmem [shape: f32[6,256], index: 2, kind: input, shape index: {}]   ;;  %s1636_s3 = inlined_call_operand.vmem [shape: f32[6,256], index: 3, kind: input, shape index: {}]   ;;  %s1637_s4 = inlined_call_operand.vmem [shape: bf16[256,256], index: 4, kind: input, shape index: {}]   ;;  %s1638_s5 = inlined_call_operand.vmem [shape: f32[2,768], index: 5, kind: output, shape index: {0}]   ;;  %s1639_s6 = inlined_call_operand.vmem [shape: f32[6,256], index: 6, kind: output, shape index: {1}]   ;;  %s1640_s7 = inlined_call_operand.vmem [shape: f32[6,256], index: 7, kind: output, shape index: {2}]  }
   0x1   :  { %s21_s25 = sshll.u32 %s1363_s24, 4  ;;  %s1339_s28 = scalar_lea.hbm %s1634_s1, 7296  ;;  %s22_s25 = int_to_ptr.vmem [resolvable:$true] %s21_s25 }
   0x2   :  { %p1340_p0 = scmp.ne.s32.totalorder %s1634_s1, %s1339_s28  ;;  %p1343_p1 = scmp.lt.u32.totalorder %s1339_s28, %s1634_s1 }
   0x4   :  { %p1345_p2 = pnand %p1343_p1, %p1340_p0 }
   0x6   :  { %1348 = shalt.err (!%p1345_p2)
}
   0x7   :  { %s1349_s10 = scalar_lea.vmem %s22_s25, 7296  ;;  %p1354_p4 = scmp.lt.s32.totalorder %s22_s25, %s22_s25 }
   0x8   :  { %p1350_p3 = scmp.ne.s32.totalorder %s22_s25, %s1349_s10  ;;  %p1355_p5 = scmp.lt.s32.totalorder %s1349_s10, %s1349_s10 }
   0xa   :  { %p1356_p6 = por %p1355_p5, %p1354_p4 }
   0xc   :  { %p1357_p7 = pnand %p1356_p6, %p1350_p3 }
   0xe   :  { %1360 = shalt.err (!%p1357_p7)
}
   0xf   :  { %s1364_s11 = smov 384   ;;  %s1365_s12 = smov 24  }
  0x10   :  { %27 = dma.hbm_to_vmem [thread:$0]  %s1634_s1, 7296, %s22_s25, [#allocation3], %s1364_s11, %s1364_s11, %s1365_s12  }
  0x11   :  { %1361 = dma.done.wait [#allocation3], 7296  }
  0x12   :  { %1362 = vsyncadd [#allocation3], 4294960000  ;;  %v1204_v0 = vld [vmem:[#allocation2 + $0x4] ss:$24 sps:$4 sm:$0xff]   ;;  %v1208_v2 = vld [vmem:[#allocation2] ss:$24 sps:$4 sm:$0xff]  }
  0x13   :  { %v1206_v1 = vld [vmem:[#allocation2 + $0xc] ss:$24 sps:$4 sm:$0xff]   ;;  %419 = vmatprep.subr.bf16.mxu0 %v1204_v0  ;;  %v1209_v3 = vld [vmem:[#allocation2 + $0x8] ss:$24 sps:$4 sm:$0xff]   ;;  %v1212_v5 = vld [vmem:[#allocation2 + $0x3c] ss:$24 sps:$4 sm:$0xff]  }
  0x14   :  { %460 = vmatprep.subr.bf16.mxu1 %v1206_v1  ;;  %v1210_v4 = vld [vmem:[#allocation2 + $0x34] ss:$24 sps:$4 sm:$0xff]   ;;  %420 = vmatpush1.bf16.msra.mxu0 %v1208_v2  ;;  %v1214_v6 = vld [vmem:[#allocation2 + $0x30] ss:$24 sps:$4 sm:$0xff]   ;;  %v1216_v8 = vld [vmem:[#allocation2 + $0x64] ss:$24 sps:$4 sm:$0xff]  }
  0x15   :  { %461 = vmatpush1.bf16.msra.mxu1 %v1209_v3  ;;  %421 = vmatprep.subr.bf16.mxu0 %v1210_v4  ;;  %v1215_v7 = vld [vmem:[#allocation2 + $0x38] ss:$24 sps:$4 sm:$0xff]   ;;  %v1218_v9 = vld [vmem:[#allocation2 + $0x6c] ss:$24 sps:$4 sm:$0xff]   ;;  %v1221_v11 = vld [vmem:[#allocation2 + $0x68] ss:$24 sps:$4 sm:$0xff]  }
  0x16   :  { %462 = vmatprep.subr.bf16.mxu1 %v1212_v5  ;;  %v1220_v10 = vld [vmem:[#allocation2 + $0x60] ss:$24 sps:$4 sm:$0xff]   ;;  %v1222_v12 = vld [vmem:[#allocation2 + $0x94] ss:$24 sps:$4 sm:$0xff]   ;;  %v1226_v14 = vld [vmem:[#allocation2 + $0x90] ss:$24 sps:$4 sm:$0xff]  }
  0x17   :  { %v1224_v13 = vld [vmem:[#allocation2 + $0x9c] ss:$24 sps:$4 sm:$0xff]   ;;  %v1227_v15 = vld [vmem:[#allocation2 + $0x98] ss:$24 sps:$4 sm:$0xff]   ;;  %v1230_v17 = vld [vmem:[#allocation2 + $0xcc] ss:$24 sps:$4 sm:$0xff]  }
  0x18   :  { %422 = vmatpush1.bf16.msra.mxu0 %v1214_v6  ;;  %v1228_v16 = vld [vmem:[#allocation2 + $0xc4] ss:$24 sps:$4 sm:$0xff]   ;;  %v1232_v18 = vld [vmem:[#allocation2 + $0xc0] ss:$24 sps:$4 sm:$0xff]   ;;  %v1234_v20 = vld [vmem:[#allocation2 + $0xf4] ss:$24 sps:$4 sm:$0xff]  }
  0x19   :  { %463 = vmatpush1.bf16.msra.mxu1 %v1215_v7  ;;  %423 = vmatprep.subr.bf16.mxu0 %v1216_v8  ;;  %v1233_v19 = vld [vmem:[#allocation2 + $0xc8] ss:$24 sps:$4 sm:$0xff]   ;;  %v1236_v21 = vld [vmem:[#allocation2 + $0xfc] ss:$24 sps:$4 sm:$0xff]   ;;  %v1239_v23 = vld [vmem:[#allocation2 + $0xf8] ss:$24 sps:$4 sm:$0xff]  }
  0x1a   :  { %464 = vmatprep.subr.bf16.mxu1 %v1218_v9  ;;  %v1238_v22 = vld [vmem:[#allocation2 + $0xf0] ss:$24 sps:$4 sm:$0xff]   ;;  %v1240_v24 = vld [vmem:[#allocation2 + $0x124] ss:$24 sps:$4 sm:$0xff]   ;;  %v1244_v26 = vld [vmem:[#allocation2 + $0x120] ss:$24 sps:$4 sm:$0xff]  }
  0x1b   :  { %v1242_v25 = vld [vmem:[#allocation2 + $0x12c] ss:$24 sps:$4 sm:$0xff]   ;;  %v1245_v27 = vld [vmem:[#allocation2 + $0x128] ss:$24 sps:$4 sm:$0xff]   ;;  %v1248_v29 = vld [vmem:[#allocation2 + $0x15c] ss:$24 sps:$4 sm:$0xff]  }
  0x1c   :  { %424 = vmatpush1.bf16.msra.mxu0 %v1220_v10  ;;  %v1246_v28 = vld [vmem:[#allocation2 + $0x154] ss:$24 sps:$4 sm:$0xff]   ;;  %v1070_v30 = vld.sshfl [vmem:[%s1633_s0] sm:$0x33 pattern:$0x76325410] }
  0x1d   :  { %465 = vmatpush1.bf16.msra.mxu1 %v1221_v11  ;;  %425 = vmatprep.subr.bf16.mxu0 %v1222_v12  ;;  %v106_v31 = vld [vmem:[#allocation2 + $0x1b0] sm:$0x11]  ;;  %v107_v32 = vld [vmem:[#allocation2 + $0x1b8] sm:$0x11]  ;;  %v47_v33 = vcombine.high %v1070_v30, %v1070_v30  ;;  %vm398_vm0 = vcmask 1040384   ;;  %vm394_vm1 = vcmask 138240   ;;  %v1436_v53 = vpack.c.bf16 %v1070_v30, %v1070_v30 }
  0x1e   :  { %466 = vmatprep.subr.bf16.mxu1 %v1224_v13  ;;  %v1250_v34 = vld [vmem:[#allocation2 + $0x150] ss:$24 sps:$4 sm:$0xff]   ;;  %v1252_v36 = vld [vmem:[#allocation2 + $0x184] ss:$24 sps:$4 sm:$0xff]   ;;  %v1126_v39 = vcombine.high %v106_v31, %v106_v31  ;;  %v1128_v40 = vcombine.high %v107_v32, %v107_v32  ;;  %v1366_v41 = vmov 0   ;;  %v1125_v45 = vcombine.low %v106_v31, %v106_v31 }
  0x1f   :  { %v1251_v35 = vld [vmem:[#allocation2 + $0x158] ss:$24 sps:$4 sm:$0xff]   ;;  %v51_v37 = vpack.c.bf16 %v47_v33, %v47_v33  ;;  %v1254_v38 = vld [vmem:[#allocation2 + $0x18c] ss:$24 sps:$4 sm:$0xff]   ;;  %v1423_v42 = vsel %vm398_vm0, 65535, %v1366_v41  ;;  %v1127_v46 = vcombine.low %v107_v32, %v107_v32 }
  0x20   :  { %426 = vmatpush1.bf16.msra.mxu0 %v1226_v14  ;;  %v1256_v43 = vld [vmem:[#allocation2 + $0x180] ss:$24 sps:$4 sm:$0xff]   ;;  %v405_v47 = vand.u32 %v1126_v39, %v1423_v42  ;;  %v411_v48 = vand.u32 %v1128_v40, %v1423_v42  ;;  %v402_v49 = vand.u32 %v1125_v45, %v1423_v42  ;;  %v1264_v51 = vld [vmem:[#allocation2 + $0x14] ss:$24 sps:$4 sm:$0xff]   ;;  %v1262_v54 = vld [vmem:[#allocation2 + $0x10] ss:$24 sps:$4 sm:$0xff]  }
  0x21   :  { %467 = vmatpush1.bf16.msra.mxu1 %v1227_v15  ;;  %427 = vmatprep.subr.bf16.mxu0 %v1228_v16  ;;  %v1257_v44 = vld [vmem:[#allocation2 + $0x188] ss:$24 sps:$4 sm:$0xff]   ;;  %v408_v50 = vand.u32 %v1127_v46, %v1423_v42  ;;  %v1434_v52 = vld [vmem:[%s1637_s4 + $0x4] ss:$8 sps:$4 sm:$0xff]   ;;  %v1447_v57 = vld [vmem:[%s1637_s4 + $0x14] ss:$8 sps:$4 sm:$0xff]  }
  0x22   :  { %468 = vmatprep.subr.bf16.mxu1 %v1230_v17  ;;  %1131 = vmatprep.mubr.msk.bf16.mxu0 %vm394_vm1, %v51_v37  ;;  %v1441_v55 = vld [vmem:[%s1637_s4] ss:$8 sps:$4 sm:$0xff]   ;;  %v1267_v56 = vld [vmem:[#allocation2 + $0x44] ss:$24 sps:$4 sm:$0xff]   ;;  %v1270_v59 = vld [vmem:[#allocation2 + $0x74] ss:$24 sps:$4 sm:$0xff]  }
  0x23   :  { %1132 = vmatprep.mubr.msk.bf16.mxu1 %vm394_vm1, %v51_v37  ;;  %v1265_v58 = vld [vmem:[#allocation2 + $0x40] ss:$24 sps:$4 sm:$0xff]   ;;  %v1461_v61 = vld [vmem:[%s1637_s4 + $0x24] ss:$8 sps:$4 sm:$0xff]   ;;  %v1268_v62 = vld [vmem:[#allocation2 + $0x70] ss:$24 sps:$4 sm:$0xff]  }
  0x24   :  { %428 = vmatpush1.bf16.msra.mxu0 %v1232_v18  ;;  %v1455_v60 = vld [vmem:[%s1637_s4 + $0x10] ss:$8 sps:$4 sm:$0xff]   ;;  %v1273_v63 = vld [vmem:[#allocation2 + $0xa4] ss:$24 sps:$4 sm:$0xff]   ;;  %v1468_v0 = vld [vmem:[%s1637_s4 + $0x20] ss:$8 sps:$4 sm:$0xff]  }
  0x25   :  { %469 = vmatpush1.bf16.msra.mxu1 %v1233_v19  ;;  %429 = vmatprep.subr.bf16.mxu0 %v1234_v20  ;;  %v1474_v1 = vld [vmem:[%s1637_s4 + $0x34] ss:$8 sps:$4 sm:$0xff]   ;;  %v1271_v2 = vld [vmem:[#allocation2 + $0xa0] ss:$24 sps:$4 sm:$0xff]   ;;  %v1486_v5 = vld [vmem:[%s1637_s4 + $0x44] ss:$8 sps:$4 sm:$0xff]  }
  0x26   :  { %470 = vmatprep.subr.bf16.mxu1 %v1236_v21  ;;  %v1276_v3 = vld [vmem:[#allocation2 + $0xd4] ss:$24 sps:$4 sm:$0xff]   ;;  %v1480_v4 = vld [vmem:[%s1637_s4 + $0x30] ss:$8 sps:$4 sm:$0xff]   ;;  %v1279_v7 = vld [vmem:[#allocation2 + $0x104] ss:$24 sps:$4 sm:$0xff]  }
  0x27   :  { %v1274_v6 = vld [vmem:[#allocation2 + $0xd0] ss:$24 sps:$4 sm:$0xff]   ;;  %v1498_v9 = vld [vmem:[%s1637_s4 + $0x54] ss:$8 sps:$4 sm:$0xff]   ;;  %v1277_v12 = vld [vmem:[#allocation2 + $0x100] ss:$24 sps:$4 sm:$0xff]  }
  0x28   :  { %430 = vmatpush1.bf16.msra.mxu0 %v1238_v22  ;;  %v1492_v8 = vld [vmem:[%s1637_s4 + $0x40] ss:$8 sps:$4 sm:$0xff]   ;;  %v1507_v13 = vld [vmem:[%s1637_s4 + $0x50] ss:$8 sps:$4 sm:$0xff]   ;;  %v1282_v14 = vld [vmem:[#allocation2 + $0x134] ss:$24 sps:$4 sm:$0xff]  }
  0x29   :  { %471 = vmatpush1.bf16.msra.mxu1 %v1239_v23  ;;  %431 = vmatprep.subr.bf16.mxu0 %v1240_v24  ;;  %v578_v10 = vld [vmem:[%s1635_s2 + $0x8] sm:$0x3f]  ;;  %v1285_v18 = vld [vmem:[#allocation2 + $0x164] ss:$24 sps:$4 sm:$0xff]   ;;  %v1283_v21 = vld [vmem:[#allocation2 + $0x160] ss:$24 sps:$4 sm:$0xff]  }
  0x2a   :  { %472 = vmatprep.subr.bf16.mxu1 %v1242_v25  ;;  %v580_v11 = vpack.c.bf16 %v578_v10, %v578_v10  ;;  %v1513_v15 = vld [vmem:[%s1637_s4 + $0x64] ss:$8 sps:$4 sm:$0xff]   ;;  %v1280_v16 = vld [vmem:[#allocation2 + $0x130] ss:$24 sps:$4 sm:$0xff]   ;;  %v1525_v19 = vld [vmem:[%s1637_s4 + $0x74] ss:$8 sps:$4 sm:$0xff]  }
  0x2b   :  { %v1519_v17 = vld [vmem:[%s1637_s4 + $0x60] ss:$8 sps:$4 sm:$0xff]   ;;  %v1531_v22 = vld [vmem:[%s1637_s4 + $0x70] ss:$8 sps:$4 sm:$0xff]   ;;  %v1288_v23 = vld [vmem:[#allocation2 + $0x194] ss:$24 sps:$4 sm:$0xff]  }
  0x2c   :  { %432 = vmatpush1.bf16.msra.mxu0 %v1244_v26  ;;  %v108_v20 = vld [vmem:[#allocation2 + $0x1c0] sm:$0x11]  ;;  %v1286_v26 = vld [vmem:[#allocation2 + $0x190] ss:$24 sps:$4 sm:$0xff]   ;;  %v1320_v30 = vld [vmem:[%s1637_s4 + $0x94] ss:$8 sps:$4 sm:$0xff]  }
  0x2d   :  { %473 = vmatpush1.bf16.msra.mxu1 %v1245_v27  ;;  %433 = vmatprep.subr.bf16.mxu0 %v1246_v28  ;;  %v1130_v24 = vcombine.high %v108_v20, %v108_v20  ;;  %v1537_v25 = vld [vmem:[%s1637_s4 + $0x84] ss:$8 sps:$4 sm:$0xff]   ;;  %v1129_v27 = vcombine.low %v108_v20, %v108_v20  ;;  %v1315_v28 = vld [vmem:[%s1637_s4 + $0x80] ss:$8 sps:$4 sm:$0xff]   ;;  %v1318_v32 = vld [vmem:[%s1637_s4 + $0x90] ss:$8 sps:$4 sm:$0xff]  }
  0x2e   :  { %474 = vmatprep.subr.bf16.mxu1 %v1248_v29  ;;  %v1323_v33 = vld [vmem:[%s1637_s4 + $0xa4] ss:$8 sps:$4 sm:$0xff]   ;;  %v1327_v40 = vld [vmem:[%s1637_s4 + $0xc0] ss:$8 sps:$4 sm:$0xff]   ;;  %v1332_v41 = vld [vmem:[%s1637_s4 + $0xd4] ss:$8 sps:$4 sm:$0xff]  }
  0x2f   :  { %v417_v29 = vand.u32 %v1130_v24, %v1423_v42  ;;  %v414_v31 = vand.u32 %v1129_v27, %v1423_v42  ;;  %v1329_v39 = vld [vmem:[%s1637_s4 + $0xc4] ss:$8 sps:$4 sm:$0xff]   ;;  %v1330_v42 = vld [vmem:[%s1637_s4 + $0xd0] ss:$8 sps:$4 sm:$0xff]   ;;  %v1338_v45 = vld [vmem:[%s1637_s4 + $0xf4] ss:$8 sps:$4 sm:$0xff]  }
  0x30   :  { %434 = vmatpush1.bf16.msra.mxu0 %v1250_v34  ;;  %v819_v34 = vld [vmem:[%s1636_s3 + $0x8] sm:$0x3f]  ;;  %v1336_v46 = vld [vmem:[%s1637_s4 + $0xf0] ss:$8 sps:$4 sm:$0xff]  }
  0x31   :  { %475 = vmatpush1.bf16.msra.mxu1 %v1251_v35  ;;  %435 = vmatprep.subr.bf16.mxu0 %v1252_v36  ;;  %v1321_v35 = vld [vmem:[%s1637_s4 + $0xa0] ss:$8 sps:$4 sm:$0xff]   ;;  %v1326_v36 = vld [vmem:[%s1637_s4 + $0xb4] ss:$8 sps:$4 sm:$0xff]  }
  0x32   :  { %476 = vmatprep.subr.bf16.mxu1 %v1254_v38  ;;  %v1324_v38 = vld [vmem:[%s1637_s4 + $0xb0] ss:$8 sps:$4 sm:$0xff]  }
  0x34   :  { %436 = vmatpush1.bf16.msra.mxu0 %v1256_v43  ;;  %v1335_v43 = vld [vmem:[%s1637_s4 + $0xe4] ss:$8 sps:$4 sm:$0xff]  }
  0x35   :  { %477 = vmatpush1.bf16.msra.mxu1 %v1257_v44  ;;  %437 = vmatprep.subr.bf16.mxu0 %v405_v47  ;;  %v1333_v44 = vld [vmem:[%s1637_s4 + $0xe0] ss:$8 sps:$4 sm:$0xff]  }
  0x36   :  { %478 = vmatprep.subr.bf16.mxu1 %v411_v48  ;;  %v577_v47 = vld [vmem:[%s1635_s2] sm:$0x3f] }
  0x37   :  { %v579_v48 = vpack.c.bf16 %v577_v47, %v577_v47 }
  0x38   :  { %438 = vmatpush1.bf16.msra.mxu0 %v402_v49  ;;  %v818_v49 = vld [vmem:[%s1636_s3] sm:$0x3f] }
  0x39   :  { %479 = vmatpush1.bf16.msra.mxu1 %v408_v50  ;;  %501 = vmatprep.subr.bf16.mxu0 %v1264_v51  ;;  %v820_v50 = vpack.c.bf16 %v818_v49, %v818_v49  ;;  %v1367_v51 = vmov 1983009808  }
  0x3a   :  { %773 = vmatprep.subr.bf16.mxu1 %v1434_v52 }
  0x3b   :  { %452 = vmatmul.mubr.bf16.vlgmr.msra.gmra.mrb[0].mxu0 %v1436_v53 }
  0x3c   :  { %493 = vmatmul.mubr.bf16.vlgmr.msra.gmra.mrb[0].mxu1 %v1436_v53  ;;  %502 = vmatpush1.bf16.msra.mxu0 %v1262_v54 }
  0x3d   :  { %774 = vmatpush1.bf16.msra.mxu1 %v1441_v55  ;;  %503 = vmatprep.subr.bf16.mxu0 %v1267_v56 }
  0x3e   :  { %1133 = vmatprep.mubr.msk.bf16.mxu0 %vm394_vm1, %v51_v37  ;;  %775 = vmatprep.subr.bf16.mxu1 %v1447_v57  ;;  %v821_v37 = vpack.c.bf16 %v819_v34, %v819_v34 }
  0x3f   :  { %805 = vmatprep.mubr.bf16.mxu1 %v580_v11 }
  0x40   :  { %504 = vmatpush1.bf16.msra.mxu0 %v1265_v58 }
  0x41   :  { %776 = vmatpush1.bf16.msra.mxu1 %v1455_v60  ;;  %505 = vmatprep.subr.bf16.mxu0 %v1270_v59 }
  0x42   :  { %777 = vmatprep.subr.bf16.mxu1 %v1461_v61 }
  0x44   :  { %506 = vmatpush1.bf16.msra.mxu0 %v1268_v62 }
  0x45   :  { %778 = vmatpush1.bf16.msra.mxu1 %v1468_v0  ;;  %507 = vmatprep.subr.bf16.mxu0 %v1273_v63 }
  0x46   :  { %779 = vmatprep.subr.bf16.mxu1 %v1474_v1 }
  0x48   :  { %508 = vmatpush1.bf16.msra.mxu0 %v1271_v2 }
  0x49   :  { %780 = vmatpush1.bf16.msra.mxu1 %v1480_v4  ;;  %509 = vmatprep.subr.bf16.mxu0 %v1276_v3 }
  0x4a   :  { %781 = vmatprep.subr.bf16.mxu1 %v1486_v5 }
  0x4c   :  { %510 = vmatpush1.bf16.msra.mxu0 %v1274_v6 }
  0x4d   :  { %782 = vmatpush1.bf16.msra.mxu1 %v1492_v8  ;;  %511 = vmatprep.subr.bf16.mxu0 %v1279_v7 }
  0x4e   :  { %783 = vmatprep.subr.bf16.mxu1 %v1498_v9 }
  0x50   :  { %512 = vmatpush1.bf16.msra.mxu0 %v1277_v12 }
  0x51   :  { %784 = vmatpush1.bf16.msra.mxu1 %v1507_v13  ;;  %513 = vmatprep.subr.bf16.mxu0 %v1282_v14 }
  0x52   :  { %785 = vmatprep.subr.bf16.mxu1 %v1513_v15 }
  0x54   :  { %514 = vmatpush1.bf16.msra.mxu0 %v1280_v16 }
  0x55   :  { %786 = vmatpush1.bf16.msra.mxu1 %v1519_v17  ;;  %515 = vmatprep.subr.bf16.mxu0 %v1285_v18 }
  0x56   :  { %787 = vmatprep.subr.bf16.mxu1 %v1525_v19 }
  0x58   :  { %516 = vmatpush1.bf16.msra.mxu0 %v1283_v21 }
  0x59   :  { %788 = vmatpush1.bf16.msra.mxu1 %v1531_v22  ;;  %517 = vmatprep.subr.bf16.mxu0 %v1288_v23 }
  0x5a   :  { %789 = vmatprep.subr.bf16.mxu1 %v1537_v25 }
  0x5c   :  { %518 = vmatpush1.bf16.msra.mxu0 %v1286_v26 }
  0x5d   :  { %790 = vmatpush1.bf16.msra.mxu1 %v1315_v28  ;;  %519 = vmatprep.subr.bf16.mxu0 %v417_v29 }
  0x5e   :  { %791 = vmatprep.subr.bf16.mxu1 %v1320_v30 }
  0x60   :  { %520 = vmatpush1.bf16.msra.mxu0 %v414_v31 }
  0x61   :  { %792 = vmatpush1.bf16.msra.mxu1 %v1318_v32  ;;  %1014 = vmatprep.subr.bf16.mxu0 %v1434_v52  ;;  %v551_v52 = vunpack.c.l.s4 %v1367_v51 }
  0x62   :  { %793 = vmatprep.subr.bf16.mxu1 %v1323_v33 }
  0x63   :  { %534 = vmatmul.mubr.bf16.vlgmr.msra.gmra.mrb[4].mxu0 %v1436_v53  ;;  %v553_v53 = vlaneseq  ;;  %v552_v54 = vunpack.c.0.s8 %v551_v52 }
  0x64   :  { %1015 = vmatpush1.bf16.msra.mxu0 %v1441_v55  ;;  %1046 = vmatprep.mubr.bf16.mxu0 %v821_v37 }
  0x65   :  { %794 = vmatpush1.bf16.msra.mxu1 %v1321_v35  ;;  %1016 = vmatprep.subr.bf16.mxu0 %v1447_v57  ;;  %v554_v55 = vshrl.u32 %v553_v53, 7 }
  0x66   :  { %795 = vmatprep.subr.bf16.mxu1 %v1326_v36 }
  0x67   :  { %v555_v58 = vsub.s32 %v552_v54, %v554_v55 }
  0x68   :  { %1017 = vmatpush1.bf16.msra.mxu0 %v1455_v60 }
  0x69   :  { %796 = vmatpush1.bf16.msra.mxu1 %v1324_v38  ;;  %1018 = vmatprep.subr.bf16.mxu0 %v1461_v61 }
  0x6a   :  { %797 = vmatprep.subr.bf16.mxu1 %v1329_v39 }
  0x6c   :  { %1019 = vmatpush1.bf16.msra.mxu0 %v1468_v0 }
  0x6d   :  { %798 = vmatpush1.bf16.msra.mxu1 %v1327_v40  ;;  %1020 = vmatprep.subr.bf16.mxu0 %v1474_v1 }
  0x6e   :  { %799 = vmatprep.subr.bf16.mxu1 %v1332_v41 }
  0x70   :  { %1021 = vmatpush1.bf16.msra.mxu0 %v1480_v4 }
  0x71   :  { %800 = vmatpush1.bf16.msra.mxu1 %v1330_v42  ;;  %1022 = vmatprep.subr.bf16.mxu0 %v1486_v5 }
  0x72   :  { %801 = vmatprep.subr.bf16.mxu1 %v1335_v43 }
  0x74   :  { %1023 = vmatpush1.bf16.msra.mxu0 %v1492_v8 }
  0x75   :  { %802 = vmatpush1.bf16.msra.mxu1 %v1333_v44  ;;  %1024 = vmatprep.subr.bf16.mxu0 %v1498_v9 }
  0x76   :  { %803 = vmatprep.subr.bf16.mxu1 %v1338_v45 }
  0x78   :  { %1025 = vmatpush1.bf16.msra.mxu0 %v1507_v13 }
  0x79   :  { %804 = vmatpush1.bf16.msra.mxu1 %v1336_v46  ;;  %1026 = vmatprep.subr.bf16.mxu0 %v1513_v15 }
  0x7c   :  { %806 = vmatmul.mubr.bf16.vlgmr.msra.gmra.mrb[4].mxu1 %v579_v48  ;;  %1027 = vmatpush1.bf16.msra.mxu0 %v1519_v17 }
  0x7d   :  { %1028 = vmatprep.subr.bf16.mxu0 %v1525_v19 }
  0x80   :  { %1029 = vmatpush1.bf16.msra.mxu0 %v1531_v22 }
  0x81   :  { %1030 = vmatprep.subr.bf16.mxu0 %v1537_v25 }
  0x84   :  { %1031 = vmatpush1.bf16.msra.mxu0 %v1315_v28 }
  0x85   :  { %1032 = vmatprep.subr.bf16.mxu0 %v1320_v30 }
  0x88   :  { %1033 = vmatpush1.bf16.msra.mxu0 %v1318_v32 }
  0x89   :  { %1034 = vmatprep.subr.bf16.mxu0 %v1323_v33 }
  0x8c   :  { %1035 = vmatpush1.bf16.msra.mxu0 %v1321_v35 }
  0x8d   :  { %1036 = vmatprep.subr.bf16.mxu0 %v1326_v36 }
  0x90   :  { %1037 = vmatpush1.bf16.msra.mxu0 %v1324_v38 }
  0x91   :  { %1038 = vmatprep.subr.bf16.mxu0 %v1329_v39 }
  0x94   :  { %1039 = vmatpush1.bf16.msra.mxu0 %v1327_v40 }
  0x95   :  { %1040 = vmatprep.subr.bf16.mxu0 %v1332_v41 }
  0x98   :  { %1041 = vmatpush1.bf16.msra.mxu0 %v1330_v42 }
  0x99   :  { %1042 = vmatprep.subr.bf16.mxu0 %v1335_v43 }
  0x9c   :  { %1043 = vmatpush1.bf16.msra.mxu0 %v1333_v44 }
  0x9d   :  { %1044 = vmatprep.subr.bf16.mxu0 %v1338_v45 }
  0xa0   :  { %1045 = vmatpush1.bf16.msra.mxu0 %v1336_v46 }
  0xa3   :  { %1047 = vmatmul.mubr.bf16.vlgmr.msra.gmra.mrb[8].mxu0 %v820_v50 }
 0x10e   :  { %v453_v56 = vpop.f32.mrb[0].mxu0 }
 0x10f   :  { %v494_v57 = vpop.f32.mrb[0].mxu1  ;;  %v455_v59 = vpop.f32.mrb[1].mxu0 }
 0x110   :  { %v496_v60 = vpop.f32.mrb[1].mxu1  ;;  %v548_v61 = vcombine.low %v453_v56, %v455_v59  ;;  %v457_v63 = vpop.f32.mrb[2].mxu0 }
 0x111   :  { %v549_v62 = vcombine.low %v494_v57, %v496_v60  ;;  %v498_v0 = vpop.f32.mrb[2].mxu1  ;;  %v458_v1 = vpop.f32.mrb[3].mxu0 }
 0x112   :  { %v499_v2 = vpop.f32.mrb[3].mxu1  ;;  %v556_v3 = vrot.slane %v548_v61, %v555_v58 }
 0x113   :  { %v563_v4 = vrot.slane %v549_v62, %v555_v58 }
 0x115   :  { %v564_v5 = vcombine.low %v556_v3, %v563_v4 }
 0x117   :  { %575 = vst [vmem:[%s1638_s5] sm:$0xff] %v564_v5 }
 0x136   :  { %v535_v6 = vpop.f32.mrb[4].mxu0 }
 0x137   :  { %v537_v7 = vpop.f32.mrb[5].mxu0 }
 0x138   :  { %v565_v8 = vcombine.low %v535_v6, %v537_v7  ;;  %v539_v9 = vpop.f32.mrb[6].mxu0 }
 0x139   :  { %v540_v10 = vpop.f32.mrb[7].mxu0 }
 0x13a   :  { %1134 = vst.sshfl [vmem:[%s1638_s5 + $0x8] sm:$0x33 pattern:$0x76325410] %v565_v8 }
 0x14f   :  { %v807_v11 = vpop.f32.mrb[4].mxu1 }
 0x150   :  { %v814_v12 = vmul.f32 0.01, %v807_v11  ;;  %v809_v13 = vpop.f32.mrb[5].mxu1 }
 0x151   :  { %v815_v14 = vmul.f32 0.01, %v809_v13  ;;  %v811_v15 = vpop.f32.mrb[6].mxu1 }
 0x152   :  { %816 = vst [vmem:[%s1639_s6] sm:$0x3f] %v814_v12  ;;  %v812_v16 = vpop.f32.mrb[7].mxu1 }
 0x153   :  { %817 = vst [vmem:[%s1639_s6 + $0x8] sm:$0x3f] %v815_v14 }
 0x176   :  { %v1048_v17 = vpop.f32.mrb[8].mxu0 }
 0x177   :  { %1055 = vst [vmem:[%s1640_s7] sm:$0x3f] %v1048_v17  ;;  %v1050_v18 = vpop.f32.mrb[9].mxu0 }
 0x178   :  { %1056 = vst [vmem:[%s1640_s7 + $0x8] sm:$0x3f] %v1050_v18  ;;  %v1052_v19 = vpop.f32.mrb[10].mxu0 }
 0x179   :  { %v1053_v20 = vpop.f32.mrb[11].mxu0 }
 0x17a   :  { %1069 = vsyncpa [#allocation3], 1 }

// kernel: _lambda_.3
= control target key start
LH: loop header
LB: loop body
LE: loop exit
PB: predicated region body
PF: predicated region fallthrough
CT: control target
= control target key end

     0   :  { %vm93_vm0 = vcmask 1040384   ;;  %vm96_vm1 = vcmask 1041408   ;;  %vm99_vm2 = vcmask 1042432   ;;  %vm102_vm3 = vcmask 1043456   ;;  %s462_s1 = inlined_call_operand.vmem [shape: f32[6,256], index: 1, kind: input, shape index: {}]   ;;  %s463_s2 = inlined_call_operand.vmem [shape: f32[6,9], index: 2, kind: input, shape index: {}]   ;;  %s464_s0 = inlined_call_operand.vmem [shape: f32[6,256], index: 0, kind: input, shape index: {}]   ;;  %s465_s3 = inlined_call_operand.vmem [shape: f32[6,256], index: 3, kind: output, shape index: {}]  }
   0x1   :  { %v380_v0 = vld [vmem:[%s462_s1] sm:$0x3f]  ;;  %v17_v1 = vld [vmem:[%s462_s1 + $0x8] sm:$0x3f]  ;;  %vm105_vm4 = vcmask 1044480   ;;  %vm108_vm5 = vcmask 1045504  }
   0x2   :  { %v386_v2 = vmul.f32 -1.7724539, %v380_v0  ;;  %v20_v3 = vmul.f32 -1.7724539, %v17_v1  ;;  %v22_v4 = vmul.f32 1.7724539, %v17_v1  ;;  %v52_v5 = vmul.f32 %v17_v1, %v17_v1 }
   0x3   :  { %v24_v6 = vmul.f32 2.4270325, %v17_v1  ;;  %v28_v7 = vrot.slane %v17_v1, 1  ;;  %v34_v8 = vmul.f32 -2.4270325, %v17_v1  ;;  %v38_v9 = vmul.f32 3.0, %v17_v1 }
   0x4   :  { %v46_v10 = vrot.slane %v17_v1, 2  ;;  %v56_v11 = vrot.slane %v52_v5, 1  ;;  %v390_v12 = vsel %vm93_vm0, 0.88622695, %v386_v2  ;;  %vm111_vm6 = vcmask 1046528  }
   0x5   :  { %v32_v13 = vmul.f32 %v28_v7, %v24_v6  ;;  %v36_v14 = vmul.f32 %v34_v8, %v28_v7  ;;  %v40_v15 = vmul.f32 %v38_v9, %v17_v1  ;;  %v197_v18 = vrot.slane %v386_v2, 3 }
   0x6   :  { %v50_v16 = vmul.f32 %v46_v10, %v34_v8  ;;  %v60_v17 = vsub.f32 %v52_v5, %v56_v11  ;;  %v198_v19 = vrot.slane %v20_v3, 3  ;;  %v204_v21 = vrot.slane %v22_v4, 3 }
   0x7   :  { %v334_v20 = vadd.f32 -1.0, %v40_v15  ;;  %v208_v22 = vrot.slane %v32_v13, 7  ;;  %v212_v23 = vrot.slane %v36_v14, 7  ;;  %v225_v26 = vsel %vm93_vm0, 0.88622695, %v197_v18 }
   0x8   :  { %v62_v24 = vmul.f32 1.2135162, %v60_v17  ;;  %v220_v25 = vrot.slane %v50_v16, 4  ;;  %v66_v27 = vrot.slane %v20_v3, 5  ;;  %v226_v29 = vsel %vm93_vm0, 0.88622695, %v198_v19 }
   0x9   :  { %v44_v28 = vmul.f32 0.7006239, %v334_v20  ;;  %v72_v30 = vrot.slane %v32_v13, 4  ;;  %v78_v31 = vrot.slane %v36_v14, 4  ;;  %v228_v33 = vsel %vm96_vm1, %v226_v29, %v204_v21 }
   0xa   :  { %v224_v32 = vrot.slane %v62_v24, 3  ;;  %v90_v34 = vrot.slane %v50_v16, 1  ;;  %v95_v35 = vsel %vm93_vm0, 0.88622695, %v20_v3  ;;  %v230_v37 = vsel %vm99_vm2, %v228_v33, %v20_v3 }
   0xb   :  { %v216_v36 = vrot.slane %v44_v28, 7  ;;  %v84_v38 = vrot.slane %v44_v28, 4  ;;  %v98_v39 = vsel %vm96_vm1, %v95_v35, %v22_v4  ;;  %v232_v40 = vsel %vm102_vm3, %v230_v37, %v208_v22  ;;  %v18_v28 = vld [vmem:[%s463_s2] sm:$0x3f] }
   0xc   :  { %v101_v41 = vsel %vm99_vm2, %v98_v39, %v66_v27  ;;  %v21_v42 = vmul.f32 1.7724539, %v380_v0  ;;  %v23_v43 = vmul.f32 2.4270325, %v380_v0  ;;  %v234_v44 = vsel %vm105_vm4, %v232_v40, %v212_v23 }
   0xd   :  { %v104_v45 = vsel %vm102_vm3, %v101_v41, %v72_v30  ;;  %v27_v46 = vrot.slane %v380_v0, 1  ;;  %v33_v47 = vmul.f32 -2.4270325, %v380_v0  ;;  %v236_v48 = vsel %vm108_vm5, %v234_v44, %v216_v36  ;;  %v15_v36 = vld [vmem:[%s464_s0 + $0x8] sm:$0x3f] }
   0xe   :  { %v107_v49 = vsel %vm105_vm4, %v104_v45, %v78_v31  ;;  %v37_v50 = vmul.f32 3.0, %v380_v0  ;;  %v45_v51 = vrot.slane %v380_v0, 2  ;;  %vm355_vm7 = vmmov 1  }
   0xf   :  { %vm412_vm8 = vmpackc.low %vm93_vm0, %vm355_vm7  ;;  %v238_v53 = vsel %vm111_vm6, %v236_v48, %v220_v25  ;;  %v110_v54 = vsel %vm108_vm5, %v107_v49, %v84_v38  ;;  %v31_v55 = vmul.f32 %v27_v46, %v23_v43  ;;  %v35_v56 = vmul.f32 %v33_v47, %v27_v46 }
  0x10   :  { %v347_v57 = vpack.c.bf16 %v224_v32, %v238_v53  ;;  %v113_v58 = vsel %vm111_vm6, %v110_v54, %v90_v34  ;;  %v39_v59 = vmul.f32 %v37_v50, %v380_v0  ;;  %v49_v60 = vmul.f32 %v45_v51, %v33_v47  ;;  %v14_v32 = vld [vmem:[%s464_s0] sm:$0x3f] }
  0x11   :  { %v341_v61 = vpack.c.bf16 %v62_v24, %v113_v58  ;;  %v51_v62 = vmul.f32 %v380_v0, %v380_v0  ;;  %v203_v63 = vrot.slane %v21_v42, 3  ;;  %v207_v1 = vrot.slane %v31_v55, 7 }
  0x12   :  { %349 = vmatprep.subr.msk.bf16.mxu1 %vm412_vm8, %v347_v57  ;;  %v333_v3 = vadd.f32 -1.0, %v39_v59  ;;  %v211_v4 = vrot.slane %v35_v56, 7  ;;  %v219_v5 = vrot.slane %v49_v60, 4  ;;  %v65_v6 = vrot.slane %v386_v2, 5 }
  0x13   :  { %343 = vmatprep.subr.msk.bf16.mxu0 %vm412_vm8, %v341_v61  ;;  %v55_v7 = vrot.slane %v51_v62, 1  ;;  %v227_v8 = vsel %vm96_vm1, %v225_v26, %v203_v63  ;;  %v71_v9 = vrot.slane %v31_v55, 4  ;;  %v77_v10 = vrot.slane %v35_v56, 4 }
  0x14   :  { %v43_v11 = vmul.f32 0.7006239, %v333_v3  ;;  %v229_v0 = vsel %vm99_vm2, %v227_v8, %v386_v2  ;;  %v89_v13 = vrot.slane %v49_v60, 1  ;;  %v97_v14 = vsel %vm96_vm1, %v390_v12, %v21_v42 }
  0x15   :  { %v59_v15 = vsub.f32 %v51_v62, %v55_v7  ;;  %v231_v16 = vsel %vm102_vm3, %v229_v0, %v207_v1  ;;  %v100_v17 = vsel %vm99_vm2, %v97_v14, %v65_v6  ;;  %v356_v22 = vmov 0.0  }
  0x16   :  { %v215_v18 = vrot.slane %v43_v11, 7  ;;  %v233_v19 = vsel %vm105_vm4, %v231_v16, %v211_v4  ;;  %v83_v20 = vrot.slane %v43_v11, 4  ;;  %v103_v21 = vsel %vm102_vm3, %v100_v17, %v71_v9  ;;  %310 = vmatprep.mubr.f32.mxu1 %v356_v22  ;;  %188 = vmatprep.mubr.f32.mxu0 %v356_v22 }
  0x17   :  { %v61_v23 = vmul.f32 1.2135162, %v59_v15  ;;  %v106_v2 = vsel %vm105_vm4, %v103_v21, %v77_v10  ;;  %vm114_vm9 = vcmask 72704   ;;  %v239_v31 = vrot.slane %v18_v28, 3 }
  0x18   :  { %v235_v24 = vsel %vm108_vm5, %v233_v19, %v215_v18  ;;  %v109_v12 = vsel %vm108_vm5, %v106_v2, %v83_v20 }
  0x19   :  { %v223_v25 = vrot.slane %v61_v23, 3  ;;  %v237_v26 = vsel %vm111_vm6, %v235_v24, %v219_v5  ;;  %v112_v27 = vsel %vm111_vm6, %v109_v12, %v89_v13 }
  0x1a   :  { %v344_v29 = vpack.c.bf16 %v61_v23, %v112_v27 }
  0x1b   :  { %v350_v30 = vpack.c.bf16 %v223_v25, %v237_v26 }
  0x1c   :  { %346 = vmatpush1.bf16.msk.msra.mxu0 %vm412_vm8, %v344_v29 }
  0x1d   :  { %352 = vmatpush1.bf16.msk.msra.mxu1 %vm412_vm8, %v350_v30 }
  0x1f   :  { %337 = vmatmul.mubr.msk.f32.vlgmr.msra.gmra.mrb[0].mxu0 %vm114_vm9, %v18_v28 }
  0x20   :  { %340 = vmatmul.mubr.msk.f32.vlgmr.msra.gmra.mrb[0].mxu1 %vm114_vm9, %v239_v31 }
  0xf2   :  { %v190_v33 = vpop.f32.mrb[0].mxu0 }
  0xf3   :  { %v312_v34 = vpop.f32.mrb[0].mxu1  ;;  %v191_v35 = vadd.f32 0.7089815, %v190_v33  ;;  %v192_v37 = vpop.f32.mrb[1].mxu0 }
  0xf4   :  { %v313_v38 = vadd.f32 0.7089815, %v312_v34  ;;  %v314_v39 = vpop.f32.mrb[1].mxu1  ;;  %v193_v40 = vadd.f32 0.7089815, %v192_v37 }
  0xf5   :  { %v315_v41 = vadd.f32 0.7089815, %v314_v39  ;;  %v195_v43 = vmul.f32 %v191_v35, %v14_v32 }
  0xf6   :  { %v319_v42 = vrot.slane %v313_v38, 5  ;;  %v196_v45 = vmul.f32 %v193_v40, %v15_v36 }
  0xf7   :  { %v320_v44 = vrot.slane %v315_v41, 5 }
  0xf8   :  { %v323_v46 = vmul.f32 %v319_v42, %v14_v32 }
  0xf9   :  { %v324_v47 = vmul.f32 %v320_v44, %v15_v36 }
  0xfa   :  { %v325_v48 = vsel %vm99_vm2, %v195_v43, %v323_v46 }
  0xfb   :  { %327 = vst [vmem:[%s465_s3] sm:$0x3f] %v325_v48  ;;  %v326_v49 = vsel %vm99_vm2, %v196_v45, %v324_v47 }
  0xfc   :  { %328 = vst [vmem:[%s465_s3 + $0x8] sm:$0x3f] %v326_v49 }

</bundles_post_ra>
